<compile_context>
chip_gen: v7x
topology: tpu7x:2x2x1
jax: 0.10.0
libtpu: 0.0.40
codegen_flags: <defaults>
</compile_context>

<pallas_src>
import jax
import jax.numpy as jnp
from jax import lax
from jax.experimental import pallas as pl
from jax.experimental.pallas import tpu as pltpu


def _round_up(x, m):
    return (x + m - 1) // m * m


def _vmem_capacity_bytes():
    """Physical VMEM per TensorCore; conservative fallback if unqueryable."""
    try:
        info = pltpu.get_tpu_info()
        v = getattr(info, "vmem_capacity_bytes", None)
        if v:
            return int(v)
    except Exception:
        pass
    return 64 << 20  # v7x-sized: the most restrictive current generation


def final_layer_kernel(x_ref, w_ref, b_ref, o_ref):
    # x_ref: (TB, K) bf16   w_ref: (Np, K) bf16   b_ref: (1, Np) f32
    # o_ref: (TB, Np) f32
    logits = lax.dot_general(
        x_ref[...], w_ref[...],
        dimension_numbers=(((1,), (1,)), ((), ())),   # x @ W^T on the MXU
        preferred_element_type=jnp.float32,           # f32 accumulator
    )
    logits = logits + b_ref[...]                      # pad classes get -1e30 (f32)
    m = jnp.max(logits, axis=-1, keepdims=True)       # numerically stable softmax
    e = jnp.exp(logits - m)                           # exp(-huge) == 0 on pad lanes
    denom = jnp.sum(e, axis=-1, keepdims=True)
    inv = pl.reciprocal(denom, approx=True)           # EUP slot (essentially free)
    inv = inv * (2.0 - denom * inv)                   # one Newton step -> ~f32 exact
    o_ref[...] = (e * inv).astype(o_ref.dtype)


def final_layer(x, weight, bias, *, batch_tile=None, stream_dtype=jnp.bfloat16):
    """Pallas port of FinalLayer.forward.

    x: (B, seq, d_emb); weight: (num_classes, seq*d_emb); bias: (num_classes,).
    Returns f32 softmax probabilities of shape (B, num_classes).
    """
    B = x.shape[0]
    x_flat = x.reshape(B, -1)                 # == torch.flatten(x, start_dim=1)
    K = x_flat.shape[1]
    N = weight.shape[0]
    Np = _round_up(max(N, 1), 128)            # lane-dense class axis
    sbytes = jnp.dtype(stream_dtype).itemsize

    # Streamed operands in bf16 (HBM-bound op); bias stays f32 so the -1e30
    # pad-class sentinel cannot overflow to -inf.
    x_s = x_flat.astype(stream_dtype)
    w_s = jnp.pad(weight, ((0, Np - N), (0, 0))).astype(stream_dtype)
    b_pad = jnp.full((1, Np), -1e30, dtype=jnp.float32)
    b_pad = b_pad.at[0, :N].set(bias.astype(jnp.float32))

    # ---- generation-aware batch tile -------------------------------------
    vmem = _vmem_capacity_bytes()
    if batch_tile is None:
        batch_tile = 512 if vmem >= (128 << 20) else 256   # v5e/v6e vs v7x
    # Fit 2 x-buffers + 1 weight buffer + 2 out buffers within ~VMEM/4.
    budget = vmem // 4
    per_row = 2 * K * sbytes + 2 * Np * 4
    avail = budget - Np * K * sbytes - Np * 4
    fit_rows = max(avail // per_row, 16) if avail > 0 else 16
    tb = max(16, min(batch_tile, (fit_rows // 16) * 16))
    # >= 2 tiles whenever the batch allows it so a 2-TC chip (v7x) shards the
    # "parallel" grid axis across both TensorCores.
    tb = min(tb, _round_up(max((B + 1) // 2, 1), 16))
    if tb >= B:
        tb = B                                # full-extent block (always legal)
    num_tiles = (B + tb - 1) // tb            # partial trailing block is masked

    def _run(single_buffer_invariants):
        if single_buffer_invariants:
            w_spec = pl.BlockSpec((Np, K), lambda i: (0, 0),
                                  pipeline_mode=pl.Buffered(1))
            b_spec = pl.BlockSpec((1, Np), lambda i: (0, 0),
                                  pipeline_mode=pl.Buffered(1))
        else:  # fallback for jax versions without single-buffer pipeline_mode
            w_spec = pl.BlockSpec((Np, K), lambda i: (0, 0))
            b_spec = pl.BlockSpec((1, Np), lambda i: (0, 0))
        return pl.pallas_call(
            final_layer_kernel,
            out_shape=jax.ShapeDtypeStruct((B, Np), jnp.float32),
            grid=(num_tiles,),
            in_specs=[
                pl.BlockSpec((tb, K), lambda i: (i, 0)),   # streamed activations
                w_spec,                                    # VMEM-resident weight
                b_spec,                                    # VMEM-resident bias
            ],
            out_specs=pl.BlockSpec((tb, Np), lambda i: (i, 0)),
            compiler_params=pltpu.CompilerParams(
                dimension_semantics=("parallel",),         # shard tiles over TCs
                vmem_limit_bytes=int(max(32 << 20, min(vmem // 2, 96 << 20))),
            ),
        )(x_s, w_s, b_pad)

    try:
        out = _run(True)
    except Exception:
        out = _run(False)

    return out[:, :N]


if __name__ == "__main__":
    # Small shapes consistent with the module's forward
    # (d_emb * max_seq_length flattened features -> num_classes -> softmax).
    batch = 2
    d_emb = 32
    max_seq_length = 8
    num_classes = 3
    K = d_emb * max_seq_length

    key = jax.random.PRNGKey(0)
    kx, kw, kb = jax.random.split(key, 3)

    x = jax.random.normal(kx, (batch, max_seq_length, d_emb), dtype=jnp.float32)
    # Deterministic synthetic parameters (nn.Linear shapes: (out, in) and (out,)).
    bound = 1.0 / (K ** 0.5)
    weight = jax.random.uniform(kw, (num_classes, K), dtype=jnp.float32,
                                minval=-bound, maxval=bound)
    bias = jax.random.uniform(kb, (num_classes,), dtype=jnp.float32,
                              minval=-bound, maxval=bound)

    probs = final_layer(x, weight, bias)
    probs = jax.block_until_ready(probs)

    # Reference with the same bf16 quantisation the kernel streams.
    xq = x.reshape(batch, -1).astype(jnp.bfloat16).astype(jnp.float32)
    wq = weight.astype(jnp.bfloat16).astype(jnp.float32)
    ref = jax.nn.softmax(xq @ wq.T + bias, axis=1)
    # Sanity vs. the full-precision module output (bf16 streaming tolerance).
    ref_f32 = jax.nn.softmax(x.reshape(batch, -1) @ weight.T + bias, axis=1)

    assert probs.shape == (batch, num_classes)
    assert jnp.allclose(probs, ref, atol=2e-3, rtol=2e-3)
    assert jnp.allclose(probs, ref_f32, atol=5e-2, rtol=5e-2)
    assert jnp.allclose(jnp.sum(probs, axis=1), 1.0, atol=1e-4)

    print("KERNEL_OK")
</pallas_src>

<mosaic_0001>
module attributes {stable_mosaic.version = 11 : i64} {
  func.func @final_layer_kernel(%arg0: i32, %arg1: memref<2x256xbf16, #tpu.memory_space<vmem>>, %arg2: memref<128x256xbf16, #tpu.memory_space<vmem>>, %arg3: memref<1x128xf32, #tpu.memory_space<vmem>>, %arg4: memref<2x128xf32, #tpu.memory_space<vmem>>) attributes {dimension_semantics = [#tpu.dimension_semantics<parallel>], iteration_bounds = array<i64: 1>, scalar_prefetch = 0 : i64, scratch_operands = 0 : i64, tpu.core_type = #tpu.core_type<tc>, window_params = [{transform_indices = @transform_0, window_bounds = array<i64: 2, 256>}, {pipeline_mode = #tpu.pipeline_mode<synchronous>, transform_indices = @transform_1, window_bounds = array<i64: 128, 256>}, {pipeline_mode = #tpu.pipeline_mode<synchronous>, transform_indices = @transform_2, window_bounds = array<i64: 1, 128>}, {transform_indices = @transform_3, window_bounds = array<i64: 2, 128>}]} {
    %c0 = arith.constant 0 : index
    %c0_0 = arith.constant 0 : index
    %0 = vector.load %arg1[%c0, %c0_0] : memref<2x256xbf16, #tpu.memory_space<vmem>>, vector<2x256xbf16>
    %c0_1 = arith.constant 0 : index
    %c0_2 = arith.constant 0 : index
    %1 = vector.load %arg2[%c0_1, %c0_2] : memref<128x256xbf16, #tpu.memory_space<vmem>>, vector<128x256xbf16>
    %cst = arith.constant dense<0.000000e+00> : vector<2x128xf32>
    %2 = tpu.matmul %0, %1, %cst {dimension_numbers = #tpu.dot_dimension_numbers<[1], [1], [0], [0], [0, 0, 1, 0], [], []>} : vector<2x256xbf16>, vector<128x256xbf16>, vector<2x128xf32> -> vector<2x128xf32>
    %c0_3 = arith.constant 0 : index
    %c0_4 = arith.constant 0 : index
    %3 = vector.load %arg3[%c0_3, %c0_4] : memref<1x128xf32, #tpu.memory_space<vmem>>, vector<1x128xf32>
    %4 = vector.broadcast %3 : vector<1x128xf32> to vector<2x128xf32>
    %5 = arith.addf %2, %4 : vector<2x128xf32>
    %cst_5 = arith.constant dense<0xFF800000> : vector<2xf32>
    %6 = vector.multi_reduction <maximumf>, %5, %cst_5 [1] : vector<2x128xf32> to vector<2xf32>
    %7 = vector.shape_cast %6 : vector<2xf32> to vector<2x1xf32>
    %8 = vector.broadcast %7 : vector<2x1xf32> to vector<2x128xf32>
    %9 = arith.subf %5, %8 : vector<2x128xf32>
    %10 = math.exp %9 : vector<2x128xf32>
    %cst_6 = arith.constant dense<0.000000e+00> : vector<2xf32>
    %11 = vector.multi_reduction <add>, %10, %cst_6 [1] : vector<2x128xf32> to vector<2xf32>
    %12 = vector.shape_cast %11 : vector<2xf32> to vector<2x1xf32>
    %13 = tpu.reciprocal %12 {approx = true} : vector<2x1xf32> -> vector<2x1xf32>
    %14 = arith.mulf %12, %13 : vector<2x1xf32>
    %cst_7 = arith.constant 2.000000e+00 : f32
    %15 = vector.broadcast %cst_7 : f32 to vector<2x1xf32>
    %16 = arith.subf %15, %14 : vector<2x1xf32>
    %17 = arith.mulf %13, %16 : vector<2x1xf32>
    %18 = vector.broadcast %17 : vector<2x1xf32> to vector<2x128xf32>
    %19 = arith.mulf %10, %18 : vector<2x128xf32>
    %c0_8 = arith.constant 0 : index
    %c0_9 = arith.constant 0 : index
    %20 = vector.load %arg4[%c0_8, %c0_9] : memref<2x128xf32, #tpu.memory_space<vmem>>, vector<2x128xf32>
    tpu.vector_store %arg4[%c0_8, %c0_9], %19 {strides = array<i32>} : memref<2x128xf32, #tpu.memory_space<vmem>>, vector<2x128xf32>,
    return
  }
  func.func @transform_0(%arg0: i32) -> (i32, i32) {
    %c0_i32 = arith.constant 0 : i32
    %c0_i32_0 = arith.constant 0 : i32
    return %arg0, %c0_i32 : i32, i32
  }
  func.func @transform_1(%arg0: i32) -> (i32, i32) {
    %c0_i32 = arith.constant 0 : i32
    %c0_i32_0 = arith.constant 0 : i32
    %c0_i32_1 = arith.constant 0 : i32
    return %c0_i32, %c0_i32_0 : i32, i32
  }
  func.func @transform_2(%arg0: i32) -> (i32, i32) {
    %c0_i32 = arith.constant 0 : i32
    %c0_i32_0 = arith.constant 0 : i32
    %c0_i32_1 = arith.constant 0 : i32
    return %c0_i32, %c0_i32_0 : i32, i32
  }
  func.func @transform_3(%arg0: i32) -> (i32, i32) {
    %c0_i32 = arith.constant 0 : i32
    %c0_i32_0 = arith.constant 0 : i32
    return %arg0, %c0_i32 : i32, i32
  }
}

module attributes {stable_mosaic.version = 11 : i64} {
  func.func @final_layer_kernel(%arg0: i32, %arg1: memref<2x256xbf16, #tpu.memory_space<vmem>>, %arg2: memref<128x256xbf16, #tpu.memory_space<vmem>>, %arg3: memref<1x128xf32, #tpu.memory_space<vmem>>, %arg4: memref<2x128xf32, #tpu.memory_space<vmem>>) attributes {dimension_semantics = [#tpu.dimension_semantics<parallel>], iteration_bounds = array<i64: 1>, scalar_prefetch = 0 : i64, scratch_operands = 0 : i64, tpu.core_type = #tpu.core_type<tc>, window_params = [{transform_indices = @transform_0, window_bounds = array<i64: 2, 256>}, {pipeline_mode = #tpu.pipeline_mode<synchronous>, transform_indices = @transform_1, window_bounds = array<i64: 128, 256>}, {pipeline_mode = #tpu.pipeline_mode<synchronous>, transform_indices = @transform_2, window_bounds = array<i64: 1, 128>}, {transform_indices = @transform_3, window_bounds = array<i64: 2, 128>}]} {
    %c0 = arith.constant 0 : index
    %c0_0 = arith.constant 0 : index
    %0 = vector.load %arg1[%c0, %c0_0] : memref<2x256xbf16, #tpu.memory_space<vmem>>, vector<2x256xbf16>
    %c0_1 = arith.constant 0 : index
    %c0_2 = arith.constant 0 : index
    %1 = vector.load %arg2[%c0_1, %c0_2] : memref<128x256xbf16, #tpu.memory_space<vmem>>, vector<128x256xbf16>
    %cst = arith.constant dense<0.000000e+00> : vector<2x128xf32>
    %2 = tpu.matmul %0, %1, %cst {dimension_numbers = #tpu.dot_dimension_numbers<[1], [1], [0], [0], [0, 0, 1, 0], [], []>} : vector<2x256xbf16>, vector<128x256xbf16>, vector<2x128xf32> -> vector<2x128xf32>
    %c0_3 = arith.constant 0 : index
    %c0_4 = arith.constant 0 : index
    %3 = vector.load %arg3[%c0_3, %c0_4] : memref<1x128xf32, #tpu.memory_space<vmem>>, vector<1x128xf32>
    %4 = vector.broadcast %3 : vector<1x128xf32> to vector<2x128xf32>
    %5 = arith.addf %2, %4 : vector<2x128xf32>
    %cst_5 = arith.constant dense<0xFF800000> : vector<2xf32>
    %6 = vector.multi_reduction <maximumf>, %5, %cst_5 [1] : vector<2x128xf32> to vector<2xf32>
    %7 = vector.shape_cast %6 : vector<2xf32> to vector<2x1xf32>
    %8 = vector.broadcast %7 : vector<2x1xf32> to vector<2x128xf32>
    %9 = arith.subf %5, %8 : vector<2x128xf32>
    %10 = math.exp %9 : vector<2x128xf32>
    %cst_6 = arith.constant dense<0.000000e+00> : vector<2xf32>
    %11 = vector.multi_reduction <add>, %10, %cst_6 [1] : vector<2x128xf32> to vector<2xf32>
    %12 = vector.shape_cast %11 : vector<2xf32> to vector<2x1xf32>
    %13 = tpu.reciprocal %12 {approx = true} : vector<2x1xf32> -> vector<2x1xf32>
    %14 = arith.mulf %12, %13 : vector<2x1xf32>
    %cst_7 = arith.constant 2.000000e+00 : f32
    %15 = vector.broadcast %cst_7 : f32 to vector<2x1xf32>
    %16 = arith.subf %15, %14 : vector<2x1xf32>
    %17 = arith.mulf %13, %16 : vector<2x1xf32>
    %18 = vector.broadcast %17 : vector<2x1xf32> to vector<2x128xf32>
    %19 = arith.mulf %10, %18 : vector<2x128xf32>
    %c0_8 = arith.constant 0 : index
    %c0_9 = arith.constant 0 : index
    %20 = vector.load %arg4[%c0_8, %c0_9] : memref<2x128xf32, #tpu.memory_space<vmem>>, vector<2x128xf32>
    tpu.vector_store %arg4[%c0_8, %c0_9], %19 {strides = array<i32>} : memref<2x128xf32, #tpu.memory_space<vmem>>, vector<2x128xf32>,
    return
  }
  func.func @transform_0(%arg0: i32) -> (i32, i32) {
    %c0_i32 = arith.constant 0 : i32
    %c0_i32_0 = arith.constant 0 : i32
    return %arg0, %c0_i32 : i32, i32
  }
  func.func @transform_1(%arg0: i32) -> (i32, i32) {
    %c0_i32 = arith.constant 0 : i32
    %c0_i32_0 = arith.constant 0 : i32
    %c0_i32_1 = arith.constant 0 : i32
    return %c0_i32, %c0_i32_0 : i32, i32
  }
  func.func @transform_2(%arg0: i32) -> (i32, i32) {
    %c0_i32 = arith.constant 0 : i32
    %c0_i32_0 = arith.constant 0 : i32
    %c0_i32_1 = arith.constant 0 : i32
    return %c0_i32, %c0_i32_0 : i32, i32
  }
  func.func @transform_3(%arg0: i32) -> (i32, i32) {
    %c0_i32 = arith.constant 0 : i32
    %c0_i32_0 = arith.constant 0 : i32
    return %arg0, %c0_i32 : i32, i32
  }
}

</mosaic_0001>

<bundles_post_ra>
// kernel: tpu_custom_call.1
= control target key start
LH: loop header
LB: loop body
LE: loop exit
PB: predicated region body
PF: predicated region fallthrough
CT: control target
= control target key end

     0   :  { %8 = vsyncpa [#allocation3], 0  ;;  %s439_s0 = inlined_call_operand.hbm [shape: bf16[2,256], index: 0, kind: input, shape index: {}]   ;;  %s440_s1 = inlined_call_operand.hbm [shape: bf16[128,256], index: 1, kind: input, shape index: {}]   ;;  %s441_s2 = inlined_call_operand.vmem [shape: f32[1,128], index: 2, kind: input, shape index: {}]   ;;  %s442_s3 = inlined_call_operand.hbm [shape: f32[2,128], index: 3, kind: output, shape index: {}]  }
   0x1   :  { %9 = vsyncpa [#allocation6], 0 }
   0x2   :  { %10 = vsyncpa [#allocation4], 0  ;;  %s367_s12 = smov [#allocation2]   ;;  %s368_s14 = smov [#allocation5]  }
   0x3   :  { %s17_s13 = sshll.u32 %s367_s12, 4  ;;  %s26_s15 = sshll.u32 %s368_s14, 4  ;;  %s18_s13 = int_to_ptr.vmem [resolvable:$true] %s17_s13  ;;  %s393_s15 = int_to_ptr.vmem [resolvable:$true] %s26_s15 }
   0x4   :  { %s295_s18 = scalar_lea.hbm %s439_s0, 32 }
   0x5   :  { %p296_p0 = scmp.ne.s32.totalorder %s439_s0, %s295_s18  ;;  %p299_p1 = scmp.lt.u32.totalorder %s295_s18, %s439_s0 }
   0x7   :  { %p301_p2 = pnand %p299_p1, %p296_p0 }
   0x9   :  { %304 = shalt.err (!%p301_p2)
}
   0xa   :  { %s305_s23 = scalar_lea.vmem %s18_s13, 32  ;;  %p310_p4 = scmp.lt.s32.totalorder %s18_s13, %s18_s13 }
   0xb   :  { %p306_p3 = scmp.ne.s32.totalorder %s18_s13, %s305_s23  ;;  %p311_p5 = scmp.lt.s32.totalorder %s305_s23, %s305_s23 }
   0xd   :  { %p312_p6 = por %p311_p5, %p310_p4 }
   0xf   :  { %p313_p7 = pnand %p312_p6, %p306_p3 }
  0x11   :  { %316 = shalt.err (!%p313_p7)
}
  0x12   :  { %20 = dma.hbm_to_vmem [thread:$0]  %s439_s0, 32, %s18_s13, [#allocation3]  }
  0x13   :  { %s317_s28 = scalar_lea.hbm %s440_s1, 2048 }
  0x14   :  { %p318_p8 = scmp.ne.s32.totalorder %s440_s1, %s317_s28  ;;  %p321_p9 = scmp.lt.u32.totalorder %s317_s28, %s440_s1 }
  0x16   :  { %p323_p10 = pnand %p321_p9, %p318_p8 }
  0x18   :  { %326 = shalt.err (!%p323_p10)
}
  0x19   :  { %s327_s6 = scalar_lea.vmem %s393_s15, 2048  ;;  %p332_p12 = scmp.lt.s32.totalorder %s393_s15, %s393_s15 }
  0x1a   :  { %p328_p11 = scmp.ne.s32.totalorder %s393_s15, %s327_s6  ;;  %p333_p13 = scmp.lt.s32.totalorder %s327_s6, %s327_s6 }
  0x1c   :  { %p334_p0 = por %p333_p13, %p332_p12 }
  0x1e   :  { %p335_p1 = pnand %p334_p0, %p328_p11 }
  0x20   :  { %338 = shalt.err (!%p335_p1)
}
  0x21   :  { %s369_s0 = smov 128   ;;  %s370_s7 = smov 8  }
  0x22   :  { %32 = dma.hbm_to_vmem [thread:$0]  %s440_s1, 2048, %s393_s15, [#allocation6], %s369_s0, %s369_s0, %s370_s7  }
  0x23   :  { %361 = dma.done.wait [#allocation3], 32  }
  0x24   :  { %362 = vsyncadd [#allocation3], 4294967264 }
  0x25   :  { %363 = dma.done.wait [#allocation6], 2048  }
  0x26   :  { %364 = vsyncadd [#allocation6], 4294965248  ;;  %v267_v0 = vld [vmem:[#allocation5 + $0x4] ss:$8 sps:$4 sm:$0xff]   ;;  %v269_v1 = vld [vmem:[#allocation5] ss:$8 sps:$4 sm:$0xff]   ;;  %v78_v5 = vlaneseq }
  0x27   :  { %171 = vmatprep.subr.bf16.mxu0 %v267_v0  ;;  %v270_v2 = vld [vmem:[#allocation5 + $0x14] ss:$8 sps:$4 sm:$0xff]   ;;  %v371_v3 = vmov 1966171168   ;;  %v272_v8 = vld [vmem:[#allocation5 + $0x10] ss:$8 sps:$4 sm:$0xff]  }
  0x28   :  { %v76_v4 = vunpack.c.l.s4 %v371_v3  ;;  %172 = vmatpush1.bf16.xpose.msra.mxu0 %v269_v1  ;;  %v79_v7 = vshrl.u32 %v78_v5, 7  ;;  %v273_v9 = vld [vmem:[#allocation5 + $0x24] ss:$8 sps:$4 sm:$0xff]   ;;  %v275_v14 = vld [vmem:[#allocation5 + $0x20] ss:$8 sps:$4 sm:$0xff]   ;;  %vm211_vm0 = vcmask 1041408  }
  0x29   :  { %173 = vmatprep.subr.bf16.mxu0 %v270_v2  ;;  %v244_v11 = vld.sshfl [vmem:[#allocation2] sm:$0x11 pattern:$0x75316420]  ;;  %v278_v16 = vld [vmem:[#allocation5 + $0x30] ss:$8 sps:$4 sm:$0xff]  }
  0x2a   :  { %v77_v6 = vunpack.c.0.s8 %v76_v4  ;;  %v74_v12 = vcombine.high %v244_v11, %v244_v11  ;;  %v276_v15 = vld [vmem:[#allocation5 + $0x34] ss:$8 sps:$4 sm:$0xff]   ;;  %v279_v17 = vld [vmem:[#allocation5 + $0x44] ss:$8 sps:$4 sm:$0xff]   ;;  %v281_v18 = vld [vmem:[#allocation5 + $0x40] ss:$8 sps:$4 sm:$0xff]  }
  0x2b   :  { %v282_v19 = vld [vmem:[#allocation5 + $0x54] ss:$8 sps:$4 sm:$0xff]   ;;  %v284_v20 = vld [vmem:[#allocation5 + $0x50] ss:$8 sps:$4 sm:$0xff]   ;;  %v285_v21 = vld [vmem:[#allocation5 + $0x64] ss:$8 sps:$4 sm:$0xff]  }
  0x2c   :  { %v80_v10 = vsub.s32 %v77_v6, %v79_v7  ;;  %v287_v22 = vld [vmem:[#allocation5 + $0x60] ss:$8 sps:$4 sm:$0xff]   ;;  %v288_v23 = vld [vmem:[#allocation5 + $0x74] ss:$8 sps:$4 sm:$0xff]   ;;  %v290_v24 = vld [vmem:[#allocation5 + $0x70] ss:$8 sps:$4 sm:$0xff]  }
  0x2d   :  { %v243_v26 = vld [vmem:[%s441_s2] ss:$0 sm:$0xff]  ;;  %s372_s2 = smov [#allocation7]  }
  0x2e   :  { %v88_v13 = vrot.slane %v74_v12, %v80_v10  ;;  %v81_v25 = vrot.slane %v244_v11, %v80_v10  ;;  %s233_s11 = sshll.u32 %s372_s2, 4  ;;  %s234_s11 = int_to_ptr.vmem [resolvable:$true] %s233_s11 }
  0x2f   :  { %s339_s12 = scalar_lea.vmem %s234_s11, 32  ;;  %p344_p3 = scmp.lt.s32.totalorder %s234_s11, %s234_s11 }
  0x30   :  { %174 = vmatpush1.bf16.xpose.msra.mxu0 %v272_v8  ;;  %203 = vmatprep.mubr.bf16.mxu0 %v88_v13  ;;  %p340_p2 = scmp.ne.s32.totalorder %s234_s11, %s339_s12  ;;  %p345_p4 = scmp.lt.s32.totalorder %s339_s12, %s339_s12 }
  0x31   :  { %175 = vmatprep.subr.bf16.mxu0 %v273_v9 }
  0x32   :  { %p346_p5 = por %p345_p4, %p344_p3 }
  0x34   :  { %p347_p6 = pnand %p346_p5, %p340_p2 }
  0x38   :  { %176 = vmatpush1.bf16.xpose.msra.mxu0 %v275_v14 }
  0x39   :  { %177 = vmatprep.subr.bf16.mxu0 %v276_v15 }
  0x40   :  { %178 = vmatpush1.bf16.xpose.msra.mxu0 %v278_v16 }
  0x41   :  { %179 = vmatprep.subr.bf16.mxu0 %v279_v17 }
  0x48   :  { %180 = vmatpush1.bf16.xpose.msra.mxu0 %v281_v18 }
  0x49   :  { %181 = vmatprep.subr.bf16.mxu0 %v282_v19 }
  0x50   :  { %182 = vmatpush1.bf16.xpose.msra.mxu0 %v284_v20 }
  0x51   :  { %183 = vmatprep.subr.bf16.mxu0 %v285_v21 }
  0x58   :  { %184 = vmatpush1.bf16.xpose.msra.mxu0 %v287_v22 }
  0x59   :  { %185 = vmatprep.subr.bf16.mxu0 %v288_v23 }
  0x60   :  { %186 = vmatpush1.bf16.xpose.msra.mxu0 %v290_v24 }
  0x67   :  { %204 = vmatmul.mubr.bf16.vlgmr.msra.gmra.mrb[0].mxu0 %v81_v25 }
 0x13a   :  { %v205_v27 = vpop.f32.mrb[0].mxu0 }
 0x13b   :  { %v206_v28 = vadd.f32 %v243_v26, %v205_v27  ;;  %v207_v29 = vpop.f32.mrb[1].mxu0 }
 0x13c   :  { %v208_v30 = vpop.f32.mrb[2].mxu0 }
 0x13d   :  { %v209_v31 = vpop.f32.mrb[3].mxu0  ;;  %v212_v32 = vsel %vm211_vm0, %v206_v28, -inf }
 0x13e   :  { %213 = vmax.xlane.f32.xlu0 %v212_v32 }
 0x1cb   :  { %v214_v33 = vpop.xlane.xlu0 %213 }
 0x1cc   :  { %v215_v34 = vsub.f32 %v206_v28, %v214_v33 }
 0x1ce   :  { %v216_v35 = vmul.f32 1.442695, %v215_v34 }
 0x1d0   :  { %291 = vpow2.f32 %v216_v35 }
 0x1da   :  { %v292_v36 = vpop.eup %291 }
 0x1db   :  { %v218_v37 = vsel %vm211_vm0, %v292_v36, 0.0 }
 0x1dc   :  { %219 = vadd.xlane.f32.xlu0 %v218_v37 }
 0x269   :  { %v220_v38 = vpop.xlane.xlu0 %219 }
 0x26a   :  { %293 = vrcp.f32 %v220_v38 }
 0x274   :  { %v294_v39 = vpop.eup %293 }
 0x275   :  { %v222_v40 = vmul.f32 %v294_v39, %v220_v38 }
 0x277   :  { %v223_v41 = vsub.f32 2.0, %v222_v40 }
 0x279   :  { %v224_v42 = vmul.f32 %v294_v39, %v223_v41 }
 0x27b   :  { %v225_v43 = vmul.f32 %v292_v36, %v224_v42 }
 0x27d   :  { %226 = vst [vmem:[#allocation7] sm:$0x3] %v225_v43 }
 0x27e   :  { %350 = shalt.err (!%p347_p6)
}
 0x27f   :  { %s351_s15 = scalar_lea.hbm %s442_s3, 32 }
 0x280   :  { %p352_p7 = scmp.ne.s32.totalorder %s442_s3, %s351_s15  ;;  %p355_p8 = scmp.lt.u32.totalorder %s351_s15, %s442_s3 }
 0x282   :  { %p357_p9 = pnand %p355_p8, %p352_p7 }
 0x284   :  { %360 = shalt.err (!%p357_p9)
}
 0x285   :  { %236 = dma.vmem_to_hbm [thread:$0]  %s234_s11, 32, %s442_s3, [#allocation4]  }
 0x286   :  { %365 = dma.done.wait [#allocation4], 32  }
 0x287   :  { %366 = vsyncadd [#allocation4], 4294967264 }
 0x288   :  { %240 = vsyncpa [#allocation3], 1 }
 0x289   :  { %241 = vsyncpa [#allocation6], 1 }
 0x28a   :  { %242 = vsyncpa [#allocation4], 1 }

// kernel: tpu_custom_call.1
= control target key start
LH: loop header
LB: loop body
LE: loop exit
PB: predicated region body
PF: predicated region fallthrough
CT: control target
= control target key end

     0   :  { %8 = vsyncpa [#allocation3], 0  ;;  %s439_s0 = inlined_call_operand.hbm [shape: bf16[2,256], index: 0, kind: input, shape index: {}]   ;;  %s440_s1 = inlined_call_operand.hbm [shape: bf16[128,256], index: 1, kind: input, shape index: {}]   ;;  %s441_s2 = inlined_call_operand.vmem [shape: f32[1,128], index: 2, kind: input, shape index: {}]   ;;  %s442_s3 = inlined_call_operand.hbm [shape: f32[2,128], index: 3, kind: output, shape index: {}]  }
   0x1   :  { %9 = vsyncpa [#allocation6], 0 }
   0x2   :  { %10 = vsyncpa [#allocation4], 0  ;;  %s367_s12 = smov [#allocation2]   ;;  %s368_s14 = smov [#allocation5]  }
   0x3   :  { %s17_s13 = sshll.u32 %s367_s12, 4  ;;  %s26_s15 = sshll.u32 %s368_s14, 4  ;;  %s18_s13 = int_to_ptr.vmem [resolvable:$true] %s17_s13  ;;  %s393_s15 = int_to_ptr.vmem [resolvable:$true] %s26_s15 }
   0x4   :  { %s295_s18 = scalar_lea.hbm %s439_s0, 32 }
   0x5   :  { %p296_p0 = scmp.ne.s32.totalorder %s439_s0, %s295_s18  ;;  %p299_p1 = scmp.lt.u32.totalorder %s295_s18, %s439_s0 }
   0x7   :  { %p301_p2 = pnand %p299_p1, %p296_p0 }
   0x9   :  { %304 = shalt.err (!%p301_p2)
}
   0xa   :  { %s305_s23 = scalar_lea.vmem %s18_s13, 32  ;;  %p310_p4 = scmp.lt.s32.totalorder %s18_s13, %s18_s13 }
   0xb   :  { %p306_p3 = scmp.ne.s32.totalorder %s18_s13, %s305_s23  ;;  %p311_p5 = scmp.lt.s32.totalorder %s305_s23, %s305_s23 }
   0xd   :  { %p312_p6 = por %p311_p5, %p310_p4 }
   0xf   :  { %p313_p7 = pnand %p312_p6, %p306_p3 }
  0x11   :  { %316 = shalt.err (!%p313_p7)
}
  0x12   :  { %20 = dma.hbm_to_vmem [thread:$0]  %s439_s0, 32, %s18_s13, [#allocation3]  }
  0x13   :  { %s317_s28 = scalar_lea.hbm %s440_s1, 2048 }
  0x14   :  { %p318_p8 = scmp.ne.s32.totalorder %s440_s1, %s317_s28  ;;  %p321_p9 = scmp.lt.u32.totalorder %s317_s28, %s440_s1 }
  0x16   :  { %p323_p10 = pnand %p321_p9, %p318_p8 }
  0x18   :  { %326 = shalt.err (!%p323_p10)
}
  0x19   :  { %s327_s6 = scalar_lea.vmem %s393_s15, 2048  ;;  %p332_p12 = scmp.lt.s32.totalorder %s393_s15, %s393_s15 }
  0x1a   :  { %p328_p11 = scmp.ne.s32.totalorder %s393_s15, %s327_s6  ;;  %p333_p13 = scmp.lt.s32.totalorder %s327_s6, %s327_s6 }
  0x1c   :  { %p334_p0 = por %p333_p13, %p332_p12 }
  0x1e   :  { %p335_p1 = pnand %p334_p0, %p328_p11 }
  0x20   :  { %338 = shalt.err (!%p335_p1)
}
  0x21   :  { %s369_s0 = smov 128   ;;  %s370_s7 = smov 8  }
  0x22   :  { %32 = dma.hbm_to_vmem [thread:$0]  %s440_s1, 2048, %s393_s15, [#allocation6], %s369_s0, %s369_s0, %s370_s7  }
  0x23   :  { %361 = dma.done.wait [#allocation3], 32  }
  0x24   :  { %362 = vsyncadd [#allocation3], 4294967264 }
  0x25   :  { %363 = dma.done.wait [#allocation6], 2048  }
  0x26   :  { %364 = vsyncadd [#allocation6], 4294965248  ;;  %v267_v0 = vld [vmem:[#allocation5 + $0x4] ss:$8 sps:$4 sm:$0xff]   ;;  %v269_v1 = vld [vmem:[#allocation5] ss:$8 sps:$4 sm:$0xff]   ;;  %v78_v5 = vlaneseq }
  0x27   :  { %171 = vmatprep.subr.bf16.mxu0 %v267_v0  ;;  %v270_v2 = vld [vmem:[#allocation5 + $0x14] ss:$8 sps:$4 sm:$0xff]   ;;  %v371_v3 = vmov 1966171168   ;;  %v272_v8 = vld [vmem:[#allocation5 + $0x10] ss:$8 sps:$4 sm:$0xff]  }
  0x28   :  { %v76_v4 = vunpack.c.l.s4 %v371_v3  ;;  %172 = vmatpush1.bf16.xpose.msra.mxu0 %v269_v1  ;;  %v79_v7 = vshrl.u32 %v78_v5, 7  ;;  %v273_v9 = vld [vmem:[#allocation5 + $0x24] ss:$8 sps:$4 sm:$0xff]   ;;  %v275_v14 = vld [vmem:[#allocation5 + $0x20] ss:$8 sps:$4 sm:$0xff]   ;;  %vm211_vm0 = vcmask 1041408  }
  0x29   :  { %173 = vmatprep.subr.bf16.mxu0 %v270_v2  ;;  %v244_v11 = vld.sshfl [vmem:[#allocation2] sm:$0x11 pattern:$0x75316420]  ;;  %v278_v16 = vld [vmem:[#allocation5 + $0x30] ss:$8 sps:$4 sm:$0xff]  }
  0x2a   :  { %v77_v6 = vunpack.c.0.s8 %v76_v4  ;;  %v74_v12 = vcombine.high %v244_v11, %v244_v11  ;;  %v276_v15 = vld [vmem:[#allocation5 + $0x34] ss:$8 sps:$4 sm:$0xff]   ;;  %v279_v17 = vld [vmem:[#allocation5 + $0x44] ss:$8 sps:$4 sm:$0xff]   ;;  %v281_v18 = vld [vmem:[#allocation5 + $0x40] ss:$8 sps:$4 sm:$0xff]  }
  0x2b   :  { %v282_v19 = vld [vmem:[#allocation5 + $0x54] ss:$8 sps:$4 sm:$0xff]   ;;  %v284_v20 = vld [vmem:[#allocation5 + $0x50] ss:$8 sps:$4 sm:$0xff]   ;;  %v285_v21 = vld [vmem:[#allocation5 + $0x64] ss:$8 sps:$4 sm:$0xff]  }
  0x2c   :  { %v80_v10 = vsub.s32 %v77_v6, %v79_v7  ;;  %v287_v22 = vld [vmem:[#allocation5 + $0x60] ss:$8 sps:$4 sm:$0xff]   ;;  %v288_v23 = vld [vmem:[#allocation5 + $0x74] ss:$8 sps:$4 sm:$0xff]   ;;  %v290_v24 = vld [vmem:[#allocation5 + $0x70] ss:$8 sps:$4 sm:$0xff]  }
  0x2d   :  { %v243_v26 = vld [vmem:[%s441_s2] ss:$0 sm:$0xff]  ;;  %s372_s2 = smov [#allocation7]  }
  0x2e   :  { %v88_v13 = vrot.slane %v74_v12, %v80_v10  ;;  %v81_v25 = vrot.slane %v244_v11, %v80_v10  ;;  %s233_s11 = sshll.u32 %s372_s2, 4  ;;  %s234_s11 = int_to_ptr.vmem [resolvable:$true] %s233_s11 }
  0x2f   :  { %s339_s12 = scalar_lea.vmem %s234_s11, 32  ;;  %p344_p3 = scmp.lt.s32.totalorder %s234_s11, %s234_s11 }
  0x30   :  { %174 = vmatpush1.bf16.xpose.msra.mxu0 %v272_v8  ;;  %203 = vmatprep.mubr.bf16.mxu0 %v88_v13  ;;  %p340_p2 = scmp.ne.s32.totalorder %s234_s11, %s339_s12  ;;  %p345_p4 = scmp.lt.s32.totalorder %s339_s12, %s339_s12 }
  0x31   :  { %175 = vmatprep.subr.bf16.mxu0 %v273_v9 }
  0x32   :  { %p346_p5 = por %p345_p4, %p344_p3 }
  0x34   :  { %p347_p6 = pnand %p346_p5, %p340_p2 }
  0x38   :  { %176 = vmatpush1.bf16.xpose.msra.mxu0 %v275_v14 }
  0x39   :  { %177 = vmatprep.subr.bf16.mxu0 %v276_v15 }
  0x40   :  { %178 = vmatpush1.bf16.xpose.msra.mxu0 %v278_v16 }
  0x41   :  { %179 = vmatprep.subr.bf16.mxu0 %v279_v17 }
  0x48   :  { %180 = vmatpush1.bf16.xpose.msra.mxu0 %v281_v18 }
  0x49   :  { %181 = vmatprep.subr.bf16.mxu0 %v282_v19 }
  0x50   :  { %182 = vmatpush1.bf16.xpose.msra.mxu0 %v284_v20 }
  0x51   :  { %183 = vmatprep.subr.bf16.mxu0 %v285_v21 }
  0x58   :  { %184 = vmatpush1.bf16.xpose.msra.mxu0 %v287_v22 }
  0x59   :  { %185 = vmatprep.subr.bf16.mxu0 %v288_v23 }
  0x60   :  { %186 = vmatpush1.bf16.xpose.msra.mxu0 %v290_v24 }
  0x67   :  { %204 = vmatmul.mubr.bf16.vlgmr.msra.gmra.mrb[0].mxu0 %v81_v25 }
 0x13a   :  { %v205_v27 = vpop.f32.mrb[0].mxu0 }
 0x13b   :  { %v206_v28 = vadd.f32 %v243_v26, %v205_v27  ;;  %v207_v29 = vpop.f32.mrb[1].mxu0 }
 0x13c   :  { %v208_v30 = vpop.f32.mrb[2].mxu0 }
 0x13d   :  { %v209_v31 = vpop.f32.mrb[3].mxu0  ;;  %v212_v32 = vsel %vm211_vm0, %v206_v28, -inf }
 0x13e   :  { %213 = vmax.xlane.f32.xlu0 %v212_v32 }
 0x1cb   :  { %v214_v33 = vpop.xlane.xlu0 %213 }
 0x1cc   :  { %v215_v34 = vsub.f32 %v206_v28, %v214_v33 }
 0x1ce   :  { %v216_v35 = vmul.f32 1.442695, %v215_v34 }
 0x1d0   :  { %291 = vpow2.f32 %v216_v35 }
 0x1da   :  { %v292_v36 = vpop.eup %291 }
 0x1db   :  { %v218_v37 = vsel %vm211_vm0, %v292_v36, 0.0 }
 0x1dc   :  { %219 = vadd.xlane.f32.xlu0 %v218_v37 }
 0x269   :  { %v220_v38 = vpop.xlane.xlu0 %219 }
 0x26a   :  { %293 = vrcp.f32 %v220_v38 }
 0x274   :  { %v294_v39 = vpop.eup %293 }
 0x275   :  { %v222_v40 = vmul.f32 %v294_v39, %v220_v38 }
 0x277   :  { %v223_v41 = vsub.f32 2.0, %v222_v40 }
 0x279   :  { %v224_v42 = vmul.f32 %v294_v39, %v223_v41 }
 0x27b   :  { %v225_v43 = vmul.f32 %v292_v36, %v224_v42 }
 0x27d   :  { %226 = vst [vmem:[#allocation7] sm:$0x3] %v225_v43 }
 0x27e   :  { %350 = shalt.err (!%p347_p6)
}
 0x27f   :  { %s351_s15 = scalar_lea.hbm %s442_s3, 32 }
 0x280   :  { %p352_p7 = scmp.ne.s32.totalorder %s442_s3, %s351_s15  ;;  %p355_p8 = scmp.lt.u32.totalorder %s351_s15, %s442_s3 }
 0x282   :  { %p357_p9 = pnand %p355_p8, %p352_p7 }
 0x284   :  { %360 = shalt.err (!%p357_p9)
}
 0x285   :  { %236 = dma.vmem_to_hbm [thread:$0]  %s234_s11, 32, %s442_s3, [#allocation4]  }
 0x286   :  { %365 = dma.done.wait [#allocation4], 32  }
 0x287   :  { %366 = vsyncadd [#allocation4], 4294967264 }
 0x288   :  { %240 = vsyncpa [#allocation3], 1 }
 0x289   :  { %241 = vsyncpa [#allocation6], 1 }
 0x28a   :  { %242 = vsyncpa [#allocation4], 1 }

</bundles_post_ra>
